<compile_context>
chip_gen: v6e
topology: v6e:2x2x1
jax: 0.10.0
libtpu: 0.0.40
codegen_flags: <defaults>
</compile_context>

<pallas_src>
import jax
import jax.numpy as jnp
from jax import lax
from jax.experimental import pallas as pl
from jax.experimental.pallas import tpu as pltpu


def _round_up(x, m):
    return -(-x // m) * m


def _tensorcores_per_chip():
    """Best-effort detection: v7x exposes 2 TensorCores per chip."""
    try:
        kind = jax.devices()[0].device_kind.lower()
    except Exception:
        return 1
    return 2 if "7" in kind else 1


# --------------------------------------------------------------------------
# Kernel: one grid step handles TB batch samples.
# --------------------------------------------------------------------------
def _spatial_broadcast_kernel(x_ref, c_ref, o_ref):
    # x_ref : (TB, L, 1)     per-sample feature columns (channels on sublanes)
    # c_ref : (2, WH)        xx / yy coordinate planes (lane-flattened)
    # o_ref : (TB, L+2, WH)  output block (lane-dense last dim)
    TB, L, _ = x_ref.shape
    WH = o_ref.shape[-1]
    coords = c_ref[...].astype(o_ref.dtype)       # (2, WH), loaded once per step

    def body(b, carry):
        # Lane-broadcast sample b's (L, 1) feature column across the spatial
        # grid.  Writing one sample at a time bounds the live vregs to the
        # (L, WH) slice, avoiding spills when TB is large.
        o_ref[b, :L, :] = jnp.broadcast_to(x_ref[b], (L, WH)).astype(o_ref.dtype)
        o_ref[b, L:, :] = coords
        return carry

    lax.fori_loop(0, TB, body, 0)


# --------------------------------------------------------------------------
# Wrapper
# --------------------------------------------------------------------------
def spatial_broadcast(x, width, height, *, samples_per_step=None,
                      out_dtype=jnp.float32,
                      vmem_budget_bytes=16 * 1024 * 1024):
    """x: (B, L) float array -> (B, L+2, width, height), matching the
    PyTorch SpatialBroadcast module (output in float32 by default)."""
    B, L = x.shape
    # torch.cat in the reference requires the spatial dims to match.
    assert width == height, "SpatialBroadcast (torch.cat) requires width == height"
    S = int(width)
    WH = S * S
    C = L + 2
    out_itemsize = jnp.dtype(out_dtype).itemsize

    # ---- VMEM-driven samples-per-step (TB) selection ----------------------
    # Per-sample footprint of the double-buffered blocks, (8,128)-padded:
    out_tile = _round_up(C, 8) * _round_up(WH, 128) * out_itemsize
    x_tile = _round_up(L, 8) * 128 * 4            # (L, 1) block lane-pads to 128 (f32)
    per_sample = 2 * (out_tile + x_tile)          # double-buffered in + out
    fixed = 2 * _round_up(2, 8) * _round_up(WH, 128) * 4   # coords block (f32)
    tb_cap = max(1, (vmem_budget_bytes - fixed) // per_sample)

    if samples_per_step is None:
        # Largest divisor of B within the VMEM budget: big blocks -> big
        # contiguous output DMAs -> HBM-writeback roofline.
        TB = 1
        for d in range(min(B, tb_cap), 0, -1):
            if B % d == 0:
                TB = d
                break
        # v7x: prefer an even grid so both TensorCores get work, but never
        # shrink the block below half the VMEM-derived size just for that.
        if _tensorcores_per_chip() >= 2 and B > 1 and (B // TB) % 2 == 1:
            for d in range(TB, 0, -1):
                if B % d == 0 and (B // d) % 2 == 0:
                    if 2 * d >= TB:
                        TB = d
                    break
    else:
        TB = int(samples_per_step)
    assert B % TB == 0, "samples_per_step must divide the batch size"
    grid = (B // TB,)

    # Explicit scoped-VMEM limit derived from the actual working set (keeps
    # the chosen tile from being silently re-tiled / OOM'ing across v5e/v6e/v7x).
    working_set = TB * per_sample + fixed
    vmem_limit = int(min(64 * 1024 * 1024,
                         max(working_set + (2 << 20), 16 * 1024 * 1024)))

    # Coordinate planes, precomputed once, lane-flattened: (2, W*H).
    # Matches torch: yy, xx = meshgrid(linspace(-1,1,H), linspace(-1,1,W));
    # channel 0 = xx (varies along columns), channel 1 = yy (varies along rows).
    lin = jnp.linspace(-1.0, 1.0, S, dtype=jnp.float32)
    yy, xx = jnp.meshgrid(lin, lin, indexing="ij")            # each (S, S)
    coords = jnp.stack([xx, yy], axis=0).reshape(2, WH)       # (2, WH)

    x3 = x.astype(jnp.float32).reshape(B, L, 1)               # (B, L, 1)

    out_flat = pl.pallas_call(
        _spatial_broadcast_kernel,
        out_shape=jax.ShapeDtypeStruct((B, C, WH), out_dtype),
        grid=grid,
        in_specs=[
            pl.BlockSpec((TB, L, 1), lambda i: (i, 0, 0)),
            pl.BlockSpec((2, WH), lambda i: (0, 0)),
        ],
        out_specs=pl.BlockSpec((TB, C, WH), lambda i: (i, 0, 0)),
        compiler_params=pltpu.CompilerParams(
            dimension_semantics=("parallel",),
            vmem_limit_bytes=vmem_limit),
        cost_estimate=pl.CostEstimate(
            flops=B * C * WH,
            transcendentals=0,
            bytes_accessed=B * C * WH * out_itemsize + B * L * 4 + 2 * WH * 4),
    )(x3, coords)

    # Pure-metadata reshape back to the PyTorch NCHW output layout.
    return out_flat.reshape(B, C, S, S)


# --------------------------------------------------------------------------
# Pure-JAX reference (mirrors the PyTorch module) for correctness checking.
# --------------------------------------------------------------------------
def spatial_broadcast_ref(x, width, height):
    B, L = x.shape
    xb = jnp.broadcast_to(x[:, :, None, None].astype(jnp.float32),
                          (B, L, width, height))
    xx_lin = jnp.linspace(-1.0, 1.0, width, dtype=jnp.float32)
    yy_lin = jnp.linspace(-1.0, 1.0, height, dtype=jnp.float32)
    yy, xx = jnp.meshgrid(yy_lin, xx_lin, indexing="ij")      # (H, W)
    coords = jnp.stack([xx, yy], axis=0)                      # (2, H, W)
    coords = jnp.broadcast_to(coords[None], (B, 2, height, width))
    return jnp.concatenate([xb, coords], axis=1)              # needs W == H


if __name__ == "__main__":
    key = jax.random.PRNGKey(0)
    B, L, W, H = 2, 32, 16, 16          # SPACE: z_what_dim=32 broadcast to 16x16
    x = jax.random.normal(key, (B, L), jnp.float32)

    out = spatial_broadcast(x, W, H)
    jax.block_until_ready(out)

    ref = spatial_broadcast_ref(x, W, H)
    assert out.shape == (B, L + 2, W, H)
    assert out.dtype == jnp.float32
    assert bool(jnp.all(jnp.isfinite(out)))
    assert bool(jnp.allclose(out, ref, atol=1e-6, rtol=1e-6))
    print("KERNEL_OK")
</pallas_src>

<mosaic_0001>
module attributes {stable_mosaic.version = 11 : i64} {
  func.func @_spatial_broadcast_kernel(%arg0: i32, %arg1: memref<2x32x1xf32, #tpu.memory_space<vmem>>, %arg2: memref<2x256xf32, #tpu.memory_space<vmem>>, %arg3: memref<2x34x256xf32, #tpu.memory_space<vmem>>) attributes {dimension_semantics = [#tpu.dimension_semantics<parallel>], iteration_bounds = array<i64: 1>, scalar_prefetch = 0 : i64, scratch_operands = 0 : i64, tpu.core_type = #tpu.core_type<tc>, window_params = [{transform_indices = @transform_0, window_bounds = array<i64: 2, 32, 1>}, {pipeline_mode = #tpu.pipeline_mode<synchronous>, transform_indices = @transform_1, window_bounds = array<i64: 2, 256>}, {transform_indices = @transform_2, window_bounds = array<i64: 2, 34, 256>}]} {
    %c0 = arith.constant 0 : index
    %c0_0 = arith.constant 0 : index
    %0 = vector.load %arg2[%c0, %c0_0] : memref<2x256xf32, #tpu.memory_space<vmem>>, vector<2x256xf32>
    %c0_i32 = arith.constant 0 : i32
    %c2_i32 = arith.constant 2 : i32
    %1 = arith.addi %c0_i32, %c2_i32 : i32
    %c1_i32 = arith.constant 1 : i32
    scf.for %arg4 = %c0_i32 to %1 step %c1_i32  : i32 {
      %2 = arith.index_cast %arg4 : i32 to index
      %c0_2 = arith.constant 0 : index
      %c0_3 = arith.constant 0 : index
      %3 = vector.load %arg1[%2, %c0_2, %c0_3] : memref<2x32x1xf32, #tpu.memory_space<vmem>>, vector<1x32x1xf32>
      %4 = vector.shape_cast %3 : vector<1x32x1xf32> to vector<32x1xf32>
      %5 = vector.shape_cast %4 : vector<32x1xf32> to vector<32x1xf32>
      %6 = vector.broadcast %5 : vector<32x1xf32> to vector<32x256xf32>
      %7 = arith.index_cast %arg4 : i32 to index
      %c0_4 = arith.constant 0 : index
      %c0_5 = arith.constant 0 : index
      %8 = vector.load %arg3[%7, %c0_4, %c0_5] : memref<2x34x256xf32, #tpu.memory_space<vmem>>, vector<1x32x256xf32>
      %9 = vector.shape_cast %8 : vector<1x32x256xf32> to vector<32x256xf32>
      %10 = vector.shape_cast %6 : vector<32x256xf32> to vector<1x32x256xf32>
      tpu.vector_store %arg3[%7, %c0_4, %c0_5], %10 {strides = array<i32>} : memref<2x34x256xf32, #tpu.memory_space<vmem>>, vector<1x32x256xf32>,
      %11 = arith.index_cast %arg4 : i32 to index
      %c32 = arith.constant 32 : index
      %c0_6 = arith.constant 0 : index
      %12 = vector.load %arg3[%11, %c32, %c0_6] : memref<2x34x256xf32, #tpu.memory_space<vmem>>, vector<1x2x256xf32>
      %13 = vector.shape_cast %12 : vector<1x2x256xf32> to vector<2x256xf32>
      %14 = vector.shape_cast %0 : vector<2x256xf32> to vector<1x2x256xf32>
      tpu.vector_store %arg3[%11, %c32, %c0_6], %14 {strides = array<i32>} : memref<2x34x256xf32, #tpu.memory_space<vmem>>, vector<1x2x256xf32>,
    }
    %c2_i32_1 = arith.constant 2 : i32
    return
  }
  func.func @transform_0(%arg0: i32) -> (i32, i32, i32) {
    %c0_i32 = arith.constant 0 : i32
    %c0_i32_0 = arith.constant 0 : i32
    %c0_i32_1 = arith.constant 0 : i32
    return %arg0, %c0_i32, %c0_i32_0 : i32, i32, i32
  }
  func.func @transform_1(%arg0: i32) -> (i32, i32) {
    %c0_i32 = arith.constant 0 : i32
    %c0_i32_0 = arith.constant 0 : i32
    %c0_i32_1 = arith.constant 0 : i32
    return %c0_i32, %c0_i32_0 : i32, i32
  }
  func.func @transform_2(%arg0: i32) -> (i32, i32, i32) {
    %c0_i32 = arith.constant 0 : i32
    %c0_i32_0 = arith.constant 0 : i32
    %c0_i32_1 = arith.constant 0 : i32
    return %arg0, %c0_i32, %c0_i32_0 : i32, i32, i32
  }
}

</mosaic_0001>

<bundles_post_ra>
// kernel: tpu_custom_call.1
= control target key start
LH: loop header
LB: loop body
LE: loop exit
PB: predicated region body
PF: predicated region fallthrough
CT: control target
= control target key end

     0   :  { %s123_s11 = smov 0   ;;  %s139_s0 = inlined_call_operand.vmem [shape: f32[2,32,1], index: 0, kind: input, shape index: {}]   ;;  %s140_s1 = inlined_call_operand.vmem [shape: f32[2,256], index: 1, kind: input, shape index: {}]   ;;  %s141_s2 = inlined_call_operand.vmem [shape: f32[2,34,256], index: 2, kind: output, shape index: {}]  }
   0x1   :  { %v83_v0 = vld.sshfl [vmem:[%s140_s1] sm:$0x33 pattern:$0x76325410] }
   0x2 LB: > { %v104_v1 = vmov 0   ;;  %v63_v2 = vcombine.high %v83_v0, %v83_v0  ;;  %s81_s12 = sshll.u32 %s102_s11, 5  ;;  %s84_s13 = smul.u32 80, %s102_s11  ;;  %s102_s11 = sphi %s123_s11, %s17_s11  }
   0x3   : > { %95 = vset.pattern.permute.xlu1 %v104_v1  ;;  %94 = vset.pattern.permute.xlu0 %v104_v1  ;;  %s19_s16 = scalar_lea.vmem %s139_s0, %s81_s12  ;;  %s17_s11 = sadd.s32 1, %s102_s11  }
   0x4   : > { %v22_v3 = vld [vmem:[%s19_s16 + $0x10] sm:$0xff]  ;;  %s46_s18 = scalar_lea.vmem %s141_s2, %s84_s13  ;;  %v20_v4 = vld [vmem:[%s19_s16] sm:$0xff]  ;;  %v23_v5 = vld [vmem:[%s19_s16 + $0x18] sm:$0xff]  ;;  %p14_p0 = scmp.ge.s32.totalorder %s17_s11, 2  }
   0x5   : > { %66 = vst [vmem:[%s46_s18 + $0x40] sm:$0x3] %v83_v0  ;;  %67 = vst [vmem:[%s46_s18 + $0x48] sm:$0x3] %v63_v2  ;;  %36 = vperm.xlu1 %95, %v22_v3   ;;  %26 = vperm.xlu0 %94, %v20_v4   ;;  %v21_v6 = vld [vmem:[%s19_s16 + $0x8] sm:$0xff] }
   0x9   : > { %41 = vperm.xlu1 %95, %v23_v5   ;;  %31 = vperm.xlu0 %94, %v21_v6  }
  0x80   : > { %v37_v7 = vpop.permute.xlu1 %36  ;;  %v27_v8 = vpop.permute.xlu0 %26 }
  0x81   : > { %51 = vst [vmem:[%s46_s18 + $0x20] sm:$0xff] %v37_v7  ;;  %52 = vst [vmem:[%s46_s18 + $0x28] sm:$0xff] %v37_v7 }
  0x82   : > { %47 = vst [vmem:[%s46_s18] sm:$0xff] %v27_v8  ;;  %48 = vst [vmem:[%s46_s18 + $0x8] sm:$0xff] %v27_v8  ;;  %16 = sbr.rel (!%p14_p0) target bundleno = 2 (0x2), region = 37 }
  0x84   : > { %v42_v9 = vpop.permute.xlu1 %41  ;;  %v32_v10 = vpop.permute.xlu0 %31 }
  0x85   : > { %53 = vst [vmem:[%s46_s18 + $0x30] sm:$0xff] %v42_v9  ;;  %54 = vst [vmem:[%s46_s18 + $0x38] sm:$0xff] %v42_v9 }
  0x86   : > { %49 = vst [vmem:[%s46_s18 + $0x10] sm:$0xff] %v32_v10  ;;  %50 = vst [vmem:[%s46_s18 + $0x18] sm:$0xff] %v32_v10 }

</bundles_post_ra>
